<compile_context>
chip_gen: v7x
topology: tpu7x:2x2x1
jax: 0.10.0
libtpu: 0.0.40
codegen_flags: <defaults>
</compile_context>

<pallas_src>
import functools
import inspect

import jax
import jax.numpy as jnp
from jax.experimental import pallas as pl
from jax.experimental.pallas import tpu as pltpu


def _round_up(x, m):
    return (x + m - 1) // m * m


def _cdiv(a, b):
    return (a + b - 1) // b


# Single-buffer the resident weight/bias operands when this jax exposes
# BlockSpec(pipeline_mode=...); otherwise fall back (and account 2 buffers).
try:
    _HAS_BUFFERED = hasattr(pl, "Buffered") and (
        "pipeline_mode" in inspect.signature(pl.BlockSpec).parameters
    )
except (TypeError, ValueError):  # pragma: no cover
    _HAS_BUFFERED = False

_RESIDENT = dict(pipeline_mode=pl.Buffered(1)) if _HAS_BUFFERED else {}


def _vmem_cap_bytes():
    """Usable VMEM budget: device capacity minus ~8 MiB headroom.

    Falls back to 64 MiB (v7x per-TensorCore capacity) if the query is
    unavailable, so the kernel never requests more VMEM than any generation
    physically has.
    """
    cap = None
    try:
        info = pltpu.get_tpu_info()
        cap = getattr(info, "vmem_capacity_bytes", None)
    except Exception:
        cap = None
    if not cap:
        cap = 64 << 20
    return max(16 << 20, int(cap) - (8 << 20))


# ----------------------------------------------------------------------------
# Kernels
# ----------------------------------------------------------------------------
def _mlp_head_resident_kernel(x_ref, w1_ref, b1_ref, w2_ref, b2_ref, o_ref):
    # x_ref: (tm, H); w1_ref/w2_ref: (H, H) pre-transposed to [in, out];
    # b1_ref/b2_ref: (1, H) f32; o_ref: (tm, H).
    w_dtype = w1_ref.dtype
    x = x_ref[...].astype(w_dtype)
    h = jnp.dot(x, w1_ref[...], preferred_element_type=jnp.float32)
    h = jnp.maximum(h + b1_ref[...], 0.0)                 # bias + ReLU in f32
    y = jnp.dot(h.astype(w_dtype), w2_ref[...],
                preferred_element_type=jnp.float32)
    o_ref[...] = (y + b2_ref[...]).astype(o_ref.dtype)


def _mlp_head_tiled_kernel(x_ref, w1_ref, b1_ref, w2_ref, b2_ref, o_ref,
                           acc_ref):
    # Hidden-dim (k) tiled variant: w1_ref (H, tk), b1_ref (1, tk),
    # w2_ref (tk, H); acc_ref (tm, H) f32 accumulates the second matmul.
    k = pl.program_id(1)

    @pl.when(k == 0)
    def _():
        acc_ref[...] = jnp.zeros_like(acc_ref)

    w_dtype = w1_ref.dtype
    x = x_ref[...].astype(w_dtype)
    h = jnp.dot(x, w1_ref[...], preferred_element_type=jnp.float32)
    h = jnp.maximum(h + b1_ref[...], 0.0)
    acc_ref[...] += jnp.dot(h.astype(w_dtype), w2_ref[...],
                            preferred_element_type=jnp.float32)

    @pl.when(k == pl.num_programs(1) - 1)
    def _():
        o_ref[...] = (acc_ref[...] + b2_ref[...]).astype(o_ref.dtype)


# ----------------------------------------------------------------------------
# Param prep (hoisted, once per model)
# ----------------------------------------------------------------------------
def prepare_params(w1, b1, w2, b2, *, weight_dtype=None):
    """PyTorch nn.Linear (out,in) weights -> (in,out); biases -> (1,H) f32.

    weight_dtype=jnp.bfloat16 stores weights in bf16 — the MXU fast path on
    ALL generations (v5e/v6e/v7x are bf16-native) and halves resident weight
    VMEM / HBM traffic.  Note the matmul inputs (x and the ReLU intermediate)
    are then also cast to bf16; accumulation stays f32 on the MXU and
    bias-add / ReLU stay f32.
    """
    w1_t = jnp.asarray(w1).T
    w2_t = jnp.asarray(w2).T
    if weight_dtype is not None:
        w1_t = w1_t.astype(weight_dtype)
        w2_t = w2_t.astype(weight_dtype)
    b1_2d = jnp.asarray(b1, jnp.float32).reshape(1, -1)
    b2_2d = jnp.asarray(b2, jnp.float32).reshape(1, -1)
    return w1_t, b1_2d, w2_t, b2_2d


# ----------------------------------------------------------------------------
# VMEM sizing helpers
# ----------------------------------------------------------------------------
def _resident_bytes(tm, H, x_item, w_item, w_bufs):
    w = w_bufs * 2 * H * H * w_item                    # W1 + W2 buffers
    acts = 2 * 2 * tm * H * x_item                     # double-buffered x & o
    inker = tm * H * (4 + 2 * w_item)                  # f32 h + casts of x, h
    bias = 4 * H * 4
    return w + acts + inker + bias + (2 << 20)


def _tiled_bytes(tm, tk, H, x_item, w_item):
    w = 2 * 2 * H * tk * w_item                        # double-buffered slabs
    acts = 2 * 2 * tm * H * x_item
    acc = tm * H * 4
    inker = tm * tk * (4 + w_item) + tm * H * w_item
    bias = 4 * (H + tk) * 4
    return w + acts + acc + inker + bias + (2 << 20)


# ----------------------------------------------------------------------------
# Wrapper
# ----------------------------------------------------------------------------
@functools.partial(jax.jit, static_argnames=("block_rows", "block_hidden"))
def contrastive_pretrain_head(x, w1_t, b1_2d, w2_t, b2_2d, *,
                              block_rows=None, block_hidden=None):
    """x: (B, H). Params come from prepare_params() (already transposed)."""
    B, H = x.shape
    x_item = jnp.dtype(x.dtype).itemsize
    w_item = jnp.dtype(w1_t.dtype).itemsize
    w_bufs = 1 if _HAS_BUFFERED else 2
    cap = _vmem_cap_bytes()

    # ---- row tile ----------------------------------------------------------
    if block_rows is None:
        tm = min(512, _round_up(B, 8))
        # Guarantee >=2 grid steps so v7x megacore can split the parallel axis.
        if B > 8:
            tm = min(tm, max(8, _round_up(_cdiv(B, 2), 8)))
    else:
        tm = int(block_rows)
    tm = max(8, (tm // 8) * 8)

    # ---- hidden tile (None => weights fully resident) -----------------------
    tk = None
    if block_hidden is not None:
        bh = int(block_hidden)
        if bh < H and H % bh == 0 and bh % 128 == 0:
            tk = bh
    elif _resident_bytes(tm, H, x_item, w_item, w_bufs) > cap and H % 128 == 0:
        # Largest multiple-of-128 divisor of H whose weight slabs fit.
        divisors = [c for c in range(128, H, 128) if H % c == 0]
        for c in reversed(divisors):
            if _tiled_bytes(tm, c, H, x_item, w_item) <= cap:
                tk = c
                break
        if tk is None and divisors:
            tk = divisors[0]

    # Shrink the row tile if the chosen mode still overflows the budget.
    def _fits(t):
        if tk is not None:
            return _tiled_bytes(t, tk, H, x_item, w_item) <= cap
        return _resident_bytes(t, H, x_item, w_item, w_bufs) <= cap

    while tm > 8 and not _fits(tm):
        tm = max(8, (tm // 2 // 8) * 8)
    # TODO(synk): if H is not a multiple of 128 and the resident weights still
    # exceed the budget at tm=8, a padded-H tiled path would be needed.

    grid_rows = _cdiv(B, tm)   # ragged tail handled by Pallas block masking
    need = (_tiled_bytes(tm, tk, H, x_item, w_item) if tk is not None
            else _resident_bytes(tm, H, x_item, w_item, w_bufs))
    vmem_limit = int(min(cap, max(8 << 20, need)))

    cost = pl.CostEstimate(
        flops=4 * B * H * H,                     # two (B,H)x(H,H) matmuls
        transcendentals=0,
        bytes_accessed=int(2 * B * H * x_item + 2 * H * H * w_item + 2 * H * 4),
    )

    if tk is None:
        grid_spec = pltpu.PrefetchScalarGridSpec(
            num_scalar_prefetch=0,
            grid=(grid_rows,),
            in_specs=[
                pl.BlockSpec((tm, H), lambda i: (i, 0)),               # x tile
                pl.BlockSpec((H, H), lambda i: (0, 0), **_RESIDENT),   # W1^T
                pl.BlockSpec((1, H), lambda i: (0, 0), **_RESIDENT),   # b1
                pl.BlockSpec((H, H), lambda i: (0, 0), **_RESIDENT),   # W2^T
                pl.BlockSpec((1, H), lambda i: (0, 0), **_RESIDENT),   # b2
            ],
            out_specs=pl.BlockSpec((tm, H), lambda i: (i, 0)),
        )
        kernel = _mlp_head_resident_kernel
        dims = ("parallel",)
    else:
        grid_spec = pltpu.PrefetchScalarGridSpec(
            num_scalar_prefetch=0,
            grid=(grid_rows, H // tk),
            in_specs=[
                pl.BlockSpec((tm, H), lambda i, k: (i, 0)),            # x tile
                pl.BlockSpec((H, tk), lambda i, k: (0, k)),            # W1 slab
                pl.BlockSpec((1, tk), lambda i, k: (0, k)),            # b1 slab
                pl.BlockSpec((tk, H), lambda i, k: (k, 0)),            # W2 slab
                pl.BlockSpec((1, H), lambda i, k: (0, 0), **_RESIDENT),  # b2
            ],
            out_specs=pl.BlockSpec((tm, H), lambda i, k: (i, 0)),
            scratch_shapes=[pltpu.VMEM((tm, H), jnp.float32)],
        )
        kernel = _mlp_head_tiled_kernel
        dims = ("parallel", "arbitrary")

    return pl.pallas_call(
        kernel,
        out_shape=jax.ShapeDtypeStruct((B, H), x.dtype),
        grid_spec=grid_spec,
        compiler_params=pltpu.CompilerParams(
            dimension_semantics=dims,
            vmem_limit_bytes=vmem_limit,
        ),
        cost_estimate=cost,
    )(x, w1_t, b1_2d, w2_t, b2_2d)


# ----------------------------------------------------------------------------
# Reference + tests
# ----------------------------------------------------------------------------
def _reference(x, w1, b1, w2, b2):
    h = jnp.maximum(x @ w1.T + b1, 0.0)
    return h @ w2.T + b2


def _make_params(key, H):
    k1, k2, k3, k4 = jax.random.split(key, 4)
    bound = 1.0 / (H ** 0.5)
    w1 = jax.random.uniform(k1, (H, H), jnp.float32, -bound, bound)
    b1 = jax.random.uniform(k2, (H,), jnp.float32, -bound, bound)
    w2 = jax.random.uniform(k3, (H, H), jnp.float32, -bound, bound)
    b2 = jax.random.uniform(k4, (H,), jnp.float32, -bound, bound)
    return w1, b1, w2, b2


if __name__ == "__main__":
    key = jax.random.PRNGKey(0)
    kx, kp, kx2, kp2 = jax.random.split(key, 4)

    # ---- 1) Weight-resident path, H lane-dense, explicit small row tile ----
    B, H = 32, 128
    x = jax.random.normal(kx, (B, H), dtype=jnp.float32)
    w1, b1, w2, b2 = _make_params(kp, H)
    ref = _reference(x, w1, b1, w2, b2)

    params_f32 = prepare_params(w1, b1, w2, b2)
    out = jax.block_until_ready(
        contrastive_pretrain_head(x, *params_f32, block_rows=8))
    assert out.shape == (B, H)
    assert jnp.allclose(out, ref, atol=2e-2, rtol=2e-2), "f32 mismatch"

    # Default tiling (>=2-step grid clamp) on the same problem.
    out_def = jax.block_until_ready(contrastive_pretrain_head(x, *params_f32))
    assert jnp.allclose(out_def, ref, atol=2e-2, rtol=2e-2), "default mismatch"

    # ---- 2) Ragged batch: masked partial last row tile, no pad copy --------
    xr = x[:13]
    out_r = jax.block_until_ready(contrastive_pretrain_head(xr, *params_f32))
    assert out_r.shape == (13, H)
    assert jnp.allclose(out_r, ref[:13], atol=2e-2, rtol=2e-2), "ragged mismatch"

    # ---- 3) bf16 weights (fast path on v5e/v6e/v7x), f32 accumulation ------
    params_bf16 = prepare_params(w1, b1, w2, b2, weight_dtype=jnp.bfloat16)
    out_bf = jax.block_until_ready(
        contrastive_pretrain_head(x, *params_bf16, block_rows=8))
    assert jnp.allclose(out_bf, ref, atol=7e-2, rtol=7e-2), "bf16-weight mismatch"

    # ---- 4) bf16 activations in -> bf16 out (no extra casts in wrapper) ----
    x_bf = x.astype(jnp.bfloat16)
    out_act_bf = jax.block_until_ready(
        contrastive_pretrain_head(x_bf, *params_bf16))
    assert out_act_bf.dtype == jnp.bfloat16
    assert jnp.allclose(out_act_bf.astype(jnp.float32), ref,
                        atol=1e-1, rtol=1e-1), "bf16-activation mismatch"

    # ---- 5) Hidden-dim tiled path (forced via block_hidden), ragged rows ---
    B2, H2 = 24, 256
    x2 = jax.random.normal(kx2, (B2, H2), dtype=jnp.float32)
    w1b, b1b, w2b, b2b = _make_params(kp2, H2)
    ref2 = _reference(x2, w1b, b1b, w2b, b2b)
    params2 = prepare_params(w1b, b1b, w2b, b2b)
    out2 = jax.block_until_ready(
        contrastive_pretrain_head(x2, *params2, block_hidden=128))
    assert out2.shape == (B2, H2)
    assert jnp.allclose(out2, ref2, atol=2e-2, rtol=2e-2), "tiled mismatch"

    print("KERNEL_OK")
</pallas_src>

<mosaic_0001>
module attributes {stable_mosaic.version = 11 : i64} {
  func.func @_mlp_head_resident_kernel(%arg0: i32, %arg1: memref<8x128xf32, #tpu.memory_space<vmem>>, %arg2: memref<128x128xf32, #tpu.memory_space<vmem>>, %arg3: memref<1x128xf32, #tpu.memory_space<vmem>>, %arg4: memref<128x128xf32, #tpu.memory_space<vmem>>, %arg5: memref<1x128xf32, #tpu.memory_space<vmem>>, %arg6: memref<8x128xf32, #tpu.memory_space<vmem>>) attributes {dimension_semantics = [#tpu.dimension_semantics<parallel>], iteration_bounds = array<i64: 4>, scalar_prefetch = 0 : i64, scratch_operands = 0 : i64, tpu.core_type = #tpu.core_type<tc>, window_params = [{transform_indices = @transform_0, window_bounds = array<i64: 8, 128>}, {pipeline_mode = #tpu.pipeline_mode<synchronous>, transform_indices = @transform_1, window_bounds = array<i64: 128, 128>}, {pipeline_mode = #tpu.pipeline_mode<synchronous>, transform_indices = @transform_2, window_bounds = array<i64: 1, 128>}, {pipeline_mode = #tpu.pipeline_mode<synchronous>, transform_indices = @transform_3, window_bounds = array<i64: 128, 128>}, {pipeline_mode = #tpu.pipeline_mode<synchronous>, transform_indices = @transform_4, window_bounds = array<i64: 1, 128>}, {transform_indices = @transform_5, window_bounds = array<i64: 8, 128>}]} {
    %c0 = arith.constant 0 : index
    %c0_0 = arith.constant 0 : index
    %0 = vector.load %arg1[%c0, %c0_0] : memref<8x128xf32, #tpu.memory_space<vmem>>, vector<8x128xf32>
    %c0_1 = arith.constant 0 : index
    %c0_2 = arith.constant 0 : index
    %1 = vector.load %arg2[%c0_1, %c0_2] : memref<128x128xf32, #tpu.memory_space<vmem>>, vector<128x128xf32>
    %cst = arith.constant dense<0.000000e+00> : vector<8x128xf32>
    %2 = tpu.matmul %0, %1, %cst {dimension_numbers = #tpu.dot_dimension_numbers<[1], [0], [0], [1], [0, 0, 1, 1], [], []>} : vector<8x128xf32>, vector<128x128xf32>, vector<8x128xf32> -> vector<8x128xf32>
    %c0_3 = arith.constant 0 : index
    %c0_4 = arith.constant 0 : index
    %3 = vector.load %arg3[%c0_3, %c0_4] : memref<1x128xf32, #tpu.memory_space<vmem>>, vector<1x128xf32>
    %4 = vector.broadcast %3 : vector<1x128xf32> to vector<8x128xf32>
    %5 = arith.addf %2, %4 : vector<8x128xf32>
    %cst_5 = arith.constant 0.000000e+00 : f32
    %6 = vector.broadcast %cst_5 : f32 to vector<8x128xf32>
    %7 = arith.maximumf %5, %6 : vector<8x128xf32>
    %c0_6 = arith.constant 0 : index
    %c0_7 = arith.constant 0 : index
    %8 = vector.load %arg4[%c0_6, %c0_7] : memref<128x128xf32, #tpu.memory_space<vmem>>, vector<128x128xf32>
    %cst_8 = arith.constant dense<0.000000e+00> : vector<8x128xf32>
    %9 = tpu.matmul %7, %8, %cst_8 {dimension_numbers = #tpu.dot_dimension_numbers<[1], [0], [0], [1], [0, 0, 1, 1], [], []>} : vector<8x128xf32>, vector<128x128xf32>, vector<8x128xf32> -> vector<8x128xf32>
    %c0_9 = arith.constant 0 : index
    %c0_10 = arith.constant 0 : index
    %10 = vector.load %arg5[%c0_9, %c0_10] : memref<1x128xf32, #tpu.memory_space<vmem>>, vector<1x128xf32>
    %11 = vector.broadcast %10 : vector<1x128xf32> to vector<8x128xf32>
    %12 = arith.addf %9, %11 : vector<8x128xf32>
    %c0_11 = arith.constant 0 : index
    %c0_12 = arith.constant 0 : index
    %13 = vector.load %arg6[%c0_11, %c0_12] : memref<8x128xf32, #tpu.memory_space<vmem>>, vector<8x128xf32>
    tpu.vector_store %arg6[%c0_11, %c0_12], %12 {strides = array<i32>} : memref<8x128xf32, #tpu.memory_space<vmem>>, vector<8x128xf32>,
    return
  }
  func.func @transform_0(%arg0: i32) -> (i32, i32) {
    %c0_i32 = arith.constant 0 : i32
    %c0_i32_0 = arith.constant 0 : i32
    return %arg0, %c0_i32 : i32, i32
  }
  func.func @transform_1(%arg0: i32) -> (i32, i32) {
    %c0_i32 = arith.constant 0 : i32
    %c0_i32_0 = arith.constant 0 : i32
    %c0_i32_1 = arith.constant 0 : i32
    return %c0_i32, %c0_i32_0 : i32, i32
  }
  func.func @transform_2(%arg0: i32) -> (i32, i32) {
    %c0_i32 = arith.constant 0 : i32
    %c0_i32_0 = arith.constant 0 : i32
    %c0_i32_1 = arith.constant 0 : i32
    return %c0_i32, %c0_i32_0 : i32, i32
  }
  func.func @transform_3(%arg0: i32) -> (i32, i32) {
    %c0_i32 = arith.constant 0 : i32
    %c0_i32_0 = arith.constant 0 : i32
    %c0_i32_1 = arith.constant 0 : i32
    return %c0_i32, %c0_i32_0 : i32, i32
  }
  func.func @transform_4(%arg0: i32) -> (i32, i32) {
    %c0_i32 = arith.constant 0 : i32
    %c0_i32_0 = arith.constant 0 : i32
    %c0_i32_1 = arith.constant 0 : i32
    return %c0_i32, %c0_i32_0 : i32, i32
  }
  func.func @transform_5(%arg0: i32) -> (i32, i32) {
    %c0_i32 = arith.constant 0 : i32
    %c0_i32_0 = arith.constant 0 : i32
    return %arg0, %c0_i32 : i32, i32
  }
}

</mosaic_0001>

<bundles_post_ra>
// kernel: contrastive_pretrain_head.1
= control target key start
LH: loop header
LB: loop body
LE: loop exit
PB: predicated region body
PF: predicated region fallthrough
CT: control target
= control target key end

     0   :  { %10 = vsyncpa [#allocation3], 0  ;;  %s1249_s0 = inlined_call_operand.hbm [shape: f32[32,128], index: 0, kind: input, shape index: {}]   ;;  %s1250_s1 = inlined_call_operand.hbm [shape: f32[128,128], index: 1, kind: input, shape index: {}]   ;;  %s1251_s2 = inlined_call_operand.vmem [shape: f32[1,128], index: 2, kind: input, shape index: {}]   ;;  %s1252_s3 = inlined_call_operand.hbm [shape: f32[128,128], index: 3, kind: input, shape index: {}]   ;;  %s1253_s4 = inlined_call_operand.vmem [shape: f32[1,128], index: 4, kind: input, shape index: {}]   ;;  %s1254_s5 = inlined_call_operand.hbm [shape: f32[32,128], index: 5, kind: output, shape index: {}]  }
   0x1   :  { %12 = vsyncpa [#allocation3 + $0x1], 0 }
   0x2   :  { %13 = vsyncpa [#allocation6], 0 }
   0x3   :  { %14 = vsyncpa [#allocation4], 0 }
   0x4   :  { %16 = vsyncpa [#allocation4 + $0x1], 0  ;;  %s1000_s18 = smov 0   ;;  %s1002_s19 = smov 0  }
   0x5   :  { %s1004_s20 = smov 0   ;;  %s1006_s21 = smov 0  }
   0x6 LB: > { %s1021_s22 = sadd.s32 4294967295, %s959_s21   ;;  %s561_s23 = sadd.s32 4294967294, %s959_s21   ;;  %s959_s21 = sphi %s1006_s21, %s1273_s21   ;;  %s955_s20 = sphi %s1004_s20, %s1272_s20   ;;  %s951_s19 = sphi %s1002_s19, %s1271_s19   ;;  %s947_s18 = sphi %s1000_s18, %s1270_s18  }
   0x7   : > { %p42_p0 = scmp.ne.s32.totalorder %s951_s19, %s947_s18  ;;  %p1255_p1 = scmp.eq.s32.totalorder %s1021_s22, 0 }
   0x8   : > { %p156_p3 = scmp.eq.s32.totalorder %s561_s23, 3  ;;  %p562_p5 = scmp.ge.s32.totalorder %s959_s21, 1 }
   0x9   : > { %p1030_p4 = por %p1255_p1, %p42_p0  ;;  %p163_p7 = scmp.lt.s32.totalorder %s959_s21, 5 }
   0xa   : > { %p1035_p6 = por %p156_p3, %p42_p0  ;;  %s961_s27 = smov [#allocation5]  }
   0xb   : > { %s1258_s24 = scalar_select %p1030_p4, 1, 0 }
   0xc   : > { %s1259_s25 = scalar_select %p1035_p6, 1, 0 }
   0xd   : > { %p1040_p8 = pnand %p562_p5, %p163_p7  ;;  %s175_s28 = sshll.u32 %s961_s27, 4  ;;  %s176_s28 = int_to_ptr.vmem [resolvable:$true] %s175_s28 }
   0xe   : > { %s962_s30 = smov [#allocation7]   ;;  %s803_s9 = scalar_lea.hbm %s1250_s1, 2048 }
   0xf   : > { %s1260_s26 = scalar_select %p1040_p8, 1, 0 }
  0x10   : > { %p743_p9 = pneg %p1040_p8  ;;  %s191_s6 = sshll.u32 %s962_s30, 4  ;;  %s1052_s6 = int_to_ptr.vmem [resolvable:$true] %s191_s6 }
  0x11   : > { %p804_p11 = scmp.ne.s32.totalorder %s1250_s1, %s803_s9  ;;  %p810_p3 = scmp.lt.u32.totalorder %s803_s9, %s1250_s1 }
  0x12   : > { %p1048_p10 = pnand %p743_p9, %p1255_p1 }
  0x14   : > { %p805_p12 = pneg %p1048_p10 }
  0x16   : > { %p806_p13 = pnand %p805_p12, %p804_p11 }
  0x18   : > { %p807_p0 = pneg %p806_p13 }
  0x1a   : > { %p812_p5 = pnand %p810_p3, %p807_p0 }
  0x1c   : > { %815 = shalt.err (!%p812_p5)
}
  0x1d   : > { %s816_s14 = scalar_lea.vmem %s176_s28, 2048  ;;  %p824_p2 = scmp.lt.s32.totalorder %s176_s28, %s176_s28 }
  0x1e   : > { %p817_p7 = scmp.ne.s32.totalorder %s176_s28, %s816_s14  ;;  %p825_p6 = scmp.lt.s32.totalorder %s816_s14, %s816_s14 }
  0x20   : > { %p819_p9 = pnand %p817_p7, %p805_p12  ;;  %p826_p4 = por %p825_p6, %p824_p2 }
  0x22   : > { %p820_p1 = pneg %p819_p9 }
  0x24   : > { %p827_p8 = pnand %p826_p4, %p820_p1 }
  0x26   : > { %830 = shalt.err (!%p827_p8)
}
  0x27   : > { %s963_s15 = smov 128   ;;  %s964_s16 = smov 8  }
  0x28   : > { %746 = dma.hbm_to_vmem [thread:$0]  (!%p1048_p10), %s1250_s1, 2048, %s176_s28, [#allocation6], %s963_s15, %s963_s15, %s964_s16  }
  0x29   : > { %s831_s7 = scalar_lea.hbm %s1252_s3, 2048 }
  0x2a   : > { %p832_p11 = scmp.ne.s32.totalorder %s1252_s3, %s831_s7  ;;  %p838_p4 = scmp.lt.u32.totalorder %s831_s7, %s1252_s3 }
  0x2c   : > { %p834_p1 = pnand %p832_p11, %p805_p12 }
  0x2e   : > { %p835_p2 = pneg %p834_p1 }
  0x30   : > { %p840_p6 = pnand %p838_p4, %p835_p2 }
  0x32   : > { %843 = shalt.err (!%p840_p6)
}
  0x33   : > { %s844_s28 = scalar_lea.vmem %s1052_s6, 2048  ;;  %p852_p3 = scmp.lt.s32.totalorder %s1052_s6, %s1052_s6 }
  0x34   : > { %p845_p8 = scmp.ne.s32.totalorder %s1052_s6, %s844_s28  ;;  %p853_p5 = scmp.lt.s32.totalorder %s844_s28, %s844_s28 }
  0x36   : > { %p847_p13 = pnand %p845_p8, %p805_p12  ;;  %p854_p7 = por %p853_p5, %p852_p3 }
  0x38   : > { %p848_p0 = pneg %p847_p13 }
  0x3a   : > { %p855_p9 = pnand %p854_p7, %p848_p0 }
  0x3c   : > { %858 = shalt.err (!%p855_p9)
}
  0x3d   : > { %749 = dma.hbm_to_vmem [thread:$0]  (!%p1048_p10), %s1252_s3, 2048, %s1052_s6, [#allocation6], %s963_s15, %s963_s15, %s964_s16  }
  0x3e   : > { %s1102_s14 = sadd.s32 1, %s959_s21   ;;  %s29_s29 = sadd.s32 1, %s955_s20 }
  0x3f   : > { %s26_s17 = ssub.s32 %s959_s21, %s1102_s14  ;;  %p36_p12 = scmp.ne.s32.totalorder %s955_s20, %s951_s19 }
  0x40   : > { %p27_p11 = scmp.eq.s32.totalorder %s26_s17, 0  ;;  %p37_p1 = scmp.eq.s32.totalorder %s959_s21, 0 }
  0x41   : > { %p1262_p2 = scmp.eq.s32.totalorder %s1021_s22, 3  ;;  %p760_p6 = scmp.lt.s32.totalorder %s959_s21, 4 }
  0x42   : > { %s1118_s27 = scalar_select %p27_p11, %s955_s20, %s29_s29  }
  0x43   : > { %p1112_p4 = por %p1262_p2, %p36_p12  ;;  %p38_p8 = por %p37_p1, %p36_p12 }
  0x44   : > { %s208_s30 = sand.u32 1, %s955_s20   ;;  %s567_s6 = sshll.u32 %s959_s21, 7 }
  0x45   : > { %s566_s7 = sshll.u32 %s208_s30, 3  ;;  %s1125_s8 = scalar_lea.hbm %s1249_s0, %s567_s6 }
  0x46   : > { %s212_s9 = scalar_lea.vmem [#allocation2], %s566_s7  ;;  %p1129_p10 = pnand %p760_p6, %p38_p8 }
  0x47   : > { %s219_s10 = sshll.u32 %s212_s9, 4  ;;  %s209_s28 = scalar_lea.sflag [#allocation3], %s208_s30  ;;  %s1127_s10 = int_to_ptr.vmem [resolvable:$true] %s219_s10 }
  0x48   : > { %s859_s12 = scalar_lea.hbm %s1125_s8, 128  ;;  %p861_p0 = pneg %p1129_p10 }
  0x49   : > { %p860_p13 = scmp.ne.s32.totalorder %s1125_s8, %s859_s12  ;;  %s864_s17 = scalar_lea.hbm %s1249_s0, 512 }
  0x4a   : > { %p865_p7 = scmp.lt.u32.totalorder %s1125_s8, %s1249_s0  ;;  %p866_p9 = scmp.lt.u32.totalorder %s864_s17, %s859_s12 }
  0x4b   : > { %p862_p3 = pnand %p861_p0, %p860_p13  ;;  %p868_p11 = scmp.lt.u32.totalorder %s859_s12, %s1125_s8 }
  0x4c   : > { %p867_p12 = por %p866_p9, %p865_p7 }
  0x4d   : > { %p863_p5 = pneg %p862_p3 }
  0x4e   : > { %p869_p1 = por %p868_p11, %p867_p12 }
  0x50   : > { %p870_p2 = pnand %p869_p1, %p863_p5 }
  0x52   : > { %873 = shalt.err (!%p870_p2)
}
  0x53   : > { %s874_s30 = scalar_lea.vmem %s1127_s10, 128  ;;  %s965_s15 = smov [#allocation2]  }
  0x54   : > { %p875_p6 = scmp.ne.s32.totalorder %s1127_s10, %s874_s30  ;;  %s879_s16 = sshll.u32 %s965_s15, 4  ;;  %s880_s16 = int_to_ptr.vmem [resolvable:$false] %s879_s16 }
  0x55   : > { %s881_s9 = scalar_lea.vmem %s880_s16, 256  ;;  %p882_p3 = scmp.lt.s32.totalorder %s1127_s10, %s880_s16 }
  0x56   : > { %p877_p8 = pnand %p875_p6, %p861_p0  ;;  %p883_p7 = scmp.lt.s32.totalorder %s881_s9, %s874_s30 }
  0x58   : > { %p878_p13 = pneg %p877_p8  ;;  %p884_p9 = por %p883_p7, %p882_p3 }
  0x5a   : > { %p885_p12 = pnand %p884_p9, %p878_p13 }
  0x5c   : > { %888 = shalt.err (!%p885_p12)
}
  0x5d   : > { %753 = dma.hbm_to_vmem [thread:$0]  (!%p1129_p10), %s1125_s8, 128, %s1127_s10, %s209_s28  }
  0x5e   : > { %p1265_p5 = scmp.ne.s32.totalorder %s1260_s26, 0 }
  0x5f   : > { %s1161_s12 = sand.u32 (!%p1265_p5), 1, %s951_s19   ;;  %p1266_p0 = scmp.ne.s32.totalorder (!%p1265_p5), %s1258_s24, 0 }
  0x60   : > { %228 = sbr.rel (%p1265_p5) target bundleno = 585 (0x249), region = 40  ;;  %s569_s13 = sshll.u32 (!%p1265_p5), %s1161_s12, 3 }
  0x61   : > { %s231_s29 = scalar_lea.sflag (!%p1265_p5), [#allocation3], %s1161_s12  ;;  %s1167_s17 = scalar_lea.vmem (!%p1265_p5), [#allocation2], %s569_s13 }
  0x67   : > { %934 = dma.done.wait (%p1266_p0), %s231_s29, 128  }
  0x68   : > { %936 = vsyncadd (%p1266_p0), %s231_s29, 4294967168  ;;  %p1267_p10 = scmp.eq.s32.totalorder %s1021_s22, 0 }
  0x6a   : > { %938 = dma.done.wait (%p1267_p10), [#allocation6], 4096   ;;  %p1268_p11 = pmov %p1267_p10 }
  0x6b   : > { %v966_v0 = vmov 0.0|0.0   ;;  %vm967_vm0 = vmmov 0   ;;  %v968_v1 = vmov 0.0   ;;  %v270_v2 = vld [vmem:[#allocation5] sm:$0xff]  ;;  %v271_v3 = vld [vmem:[#allocation5 + $0x8] sm:$0xff]  ;;  %v272_v4 = vld [vmem:[#allocation5 + $0x10] sm:$0xff] }
  0x6c   : > { %940 = vsyncadd (%p1268_p11), [#allocation6], 4294963200  ;;  %683 = vmatprep.subr.bf16.mxu0 %v966_v0  ;;  %645 = vmatprep.mubr.msk.f32.mxu0 %vm967_vm0, %v968_v1  ;;  %v684_v5 = vpack.c.bf16 %v271_v3, %v270_v2  ;;  %v273_v6 = vld [vmem:[#allocation5 + $0x18] sm:$0xff]  ;;  %v274_v8 = vld [vmem:[#allocation5 + $0x20] sm:$0xff]  ;;  %s576_s11 = sshll.u32 %s1021_s22, 7  ;;  %s268_s28 = scalar_lea.vmem [#allocation8], %s569_s13 }
  0x6d   : > { %707 = vmatprep.subr.bf16.mxu1 %v966_v0  ;;  %680 = vmatprep.mubr.msk.f32.mxu1 %vm967_vm0, %v968_v1  ;;  %v687_v7 = vpack.c.bf16 %v273_v6, %v272_v4  ;;  %v275_v9 = vld [vmem:[#allocation5 + $0x28] sm:$0xff]  ;;  %v364_v10 = vld [vmem:[#allocation7] sm:$0xff]  ;;  %v366_v12 = vld [vmem:[#allocation7 + $0x10] sm:$0xff]  ;;  %s472_s7 = sshll.u32 %s268_s28, 4  ;;  %s1206_s15 = scalar_lea.hbm %s1254_s5, %s576_s11  ;;  %s1208_s7 = int_to_ptr.vmem [resolvable:$true] %s472_s7 }
  0x6e   : > { %685 = vmatpush3.bf16.msra.mxu0 %v684_v5  ;;  %v365_v11 = vld [vmem:[#allocation7 + $0x8] sm:$0xff]  ;;  %v367_v13 = vld [vmem:[#allocation7 + $0x18] sm:$0xff]  ;;  %v690_v14 = vpack.c.bf16 %v275_v9, %v274_v8  ;;  %v276_v16 = vld [vmem:[#allocation5 + $0x30] sm:$0xff]  ;;  %s459_s16 = scalar_lea.sflag [#allocation4], %s1161_s12  ;;  %s889_s9 = scalar_lea.vmem %s1208_s7, 128 }
  0x6f   : > { %686 = vmatprep.subr.bf16.mxu0 %v966_v0  ;;  %v708_v15 = vpack.c.bf16 %v365_v11, %v364_v10  ;;  %v277_v17 = vld [vmem:[#allocation5 + $0x38] sm:$0xff]  ;;  %v711_v18 = vpack.c.bf16 %v367_v13, %v366_v12  ;;  %v368_v19 = vld [vmem:[#allocation7 + $0x20] sm:$0xff]  ;;  %v369_v20 = vld [vmem:[#allocation7 + $0x28] sm:$0xff]  ;;  %p890_p1 = scmp.ne.s32.totalorder %s1208_s7, %s889_s9  ;;  %s969_s22 = smov [#allocation8]  }
  0x70   : > { %v693_v21 = vpack.c.bf16 %v277_v17, %v276_v16  ;;  %v278_v22 = vld [vmem:[#allocation5 + $0x40] sm:$0xff]  ;;  %v279_v23 = vld [vmem:[#allocation5 + $0x48] sm:$0xff]  ;;  %v714_v24 = vpack.c.bf16 %v369_v20, %v368_v19  ;;  %v370_v25 = vld [vmem:[#allocation7 + $0x30] sm:$0xff]  ;;  %s893_s13 = sshll.u32 %s969_s22, 4  ;;  %s894_s13 = int_to_ptr.vmem [resolvable:$false] %s893_s13 }
  0x71   : > { %709 = vmatpush3.bf16.msra.mxu1 %v708_v15  ;;  %v371_v26 = vld [vmem:[#allocation7 + $0x38] sm:$0xff]  ;;  %v696_v27 = vpack.c.bf16 %v279_v23, %v278_v22  ;;  %v280_v28 = vld [vmem:[#allocation5 + $0x50] sm:$0xff]  ;;  %v372_v31 = vld [vmem:[#allocation7 + $0x40] sm:$0xff]  ;;  %p891_p2 = pnand %p890_p1, %p1112_p4  ;;  %s895_s29 = scalar_lea.vmem %s894_s13, 256 }
  0x72   : > { %688 = vmatpush3.bf16.msra.mxu0 %v687_v7  ;;  %710 = vmatprep.subr.bf16.mxu1 %v966_v0  ;;  %v281_v29 = vld [vmem:[#allocation5 + $0x58] sm:$0xff]  ;;  %v717_v30 = vpack.c.bf16 %v371_v26, %v370_v25  ;;  %v373_v32 = vld [vmem:[#allocation7 + $0x48] sm:$0xff]  ;;  %v282_v34 = vld [vmem:[#allocation5 + $0x60] sm:$0xff]  ;;  %p896_p8 = scmp.lt.s32.totalorder %s1208_s7, %s894_s13  ;;  %p897_p13 = scmp.lt.s32.totalorder %s895_s29, %s889_s9 }
  0x73   : > { %689 = vmatprep.subr.bf16.mxu0 %v966_v0  ;;  %v699_v33 = vpack.c.bf16 %v281_v29, %v280_v28  ;;  %v283_v35 = vld [vmem:[#allocation5 + $0x68] sm:$0xff]  ;;  %v720_v36 = vpack.c.bf16 %v373_v32, %v372_v31  ;;  %v374_v37 = vld [vmem:[#allocation7 + $0x50] sm:$0xff]  ;;  %v375_v38 = vld [vmem:[#allocation7 + $0x58] sm:$0xff]  ;;  %p892_p6 = pneg %p891_p2 }
  0x74   : > { %v702_v39 = vpack.c.bf16 %v283_v35, %v282_v34  ;;  %v284_v40 = vld [vmem:[#allocation5 + $0x70] sm:$0xff]  ;;  %v285_v41 = vld [vmem:[#allocation5 + $0x78] sm:$0xff]  ;;  %v723_v42 = vpack.c.bf16 %v375_v38, %v374_v37  ;;  %v376_v43 = vld [vmem:[#allocation7 + $0x60] sm:$0xff]  ;;  %p898_p3 = por %p897_p13, %p896_p8 }
  0x75   : > { %712 = vmatpush3.bf16.msra.mxu1 %v711_v18  ;;  %v377_v44 = vld [vmem:[#allocation7 + $0x68] sm:$0xff]  ;;  %v705_v45 = vpack.c.bf16 %v285_v41, %v284_v40  ;;  %v269_v47 = vld [vmem:[%s1167_s17] sm:$0xff] }
  0x76   : > { %691 = vmatpush3.bf16.msra.mxu0 %v690_v14  ;;  %713 = vmatprep.subr.bf16.mxu1 %v966_v0  ;;  %v726_v46 = vpack.c.bf16 %v377_v44, %v376_v43  ;;  %v378_v48 = vld [vmem:[#allocation7 + $0x70] sm:$0xff]  ;;  %v379_v49 = vld [vmem:[#allocation7 + $0x78] sm:$0xff]  ;;  %p899_p7 = pnand %p898_p3, %p892_p6 }
  0x77   : > { %692 = vmatprep.subr.bf16.mxu0 %v966_v0  ;;  %v729_v50 = vpack.c.bf16 %v379_v49, %v378_v48  ;;  %v573_v51 = vld [vmem:[%s1251_s2] ss:$0 sm:$0xff] }
  0x78   : > { %v574_v56 = vld [vmem:[%s1253_s4] ss:$0 sm:$0xff] }
  0x79   : > { %715 = vmatpush3.bf16.msra.mxu1 %v714_v24 }
  0x7a   : > { %694 = vmatpush3.bf16.msra.mxu0 %v693_v21  ;;  %716 = vmatprep.subr.bf16.mxu1 %v966_v0 }
  0x7b   : > { %695 = vmatprep.subr.bf16.mxu0 %v966_v0 }
  0x7d   : > { %718 = vmatpush3.bf16.msra.mxu1 %v717_v30 }
  0x7e   : > { %697 = vmatpush3.bf16.msra.mxu0 %v696_v27  ;;  %719 = vmatprep.subr.bf16.mxu1 %v966_v0 }
  0x7f   : > { %698 = vmatprep.subr.bf16.mxu0 %v966_v0 }
  0x81   : > { %721 = vmatpush3.bf16.msra.mxu1 %v720_v36 }
  0x82   : > { %700 = vmatpush3.bf16.msra.mxu0 %v699_v33  ;;  %722 = vmatprep.subr.bf16.mxu1 %v966_v0 }
  0x83   : > { %701 = vmatprep.subr.bf16.mxu0 %v966_v0 }
  0x85   : > { %724 = vmatpush3.bf16.msra.mxu1 %v723_v42 }
  0x86   : > { %703 = vmatpush3.bf16.msra.mxu0 %v702_v39  ;;  %725 = vmatprep.subr.bf16.mxu1 %v966_v0 }
  0x87   : > { %704 = vmatprep.subr.bf16.mxu0 %v966_v0 }
  0x89   : > { %727 = vmatpush3.bf16.msra.mxu1 %v726_v46 }
  0x8a   : > { %706 = vmatpush3.bf16.msra.mxu0 %v705_v45  ;;  %728 = vmatprep.subr.bf16.mxu1 %v966_v0 }
  0x8d   : > { %646 = vmatmul.mubr.f32.vlgmr.msra.gmra.mrb[0].mxu0 %v269_v47  ;;  %730 = vmatpush3.bf16.msra.mxu1 %v729_v50 }
 0x160   : > { %v359_v52 = vpop.f32.mrb[0].mxu0 }
 0x161   : > { %v360_v53 = vadd.f32 %v573_v51, %v359_v52  ;;  %v647_v54 = vpop.f32.mrb[1].mxu0 }
 0x163   : > { %v363_v55 = vmax.f32 %v360_v53, 0.0 }
 0x165   : > { %681 = vmatmul.mubr.f32.vlgmr.msra.gmra.mrb[0].mxu1 %v363_v55 }
 0x238   : > { %v453_v57 = vpop.f32.mrb[0].mxu1 }
 0x239   : > { %v454_v58 = vadd.f32 %v574_v56, %v453_v57  ;;  %v682_v59 = vpop.f32.mrb[1].mxu1 }
 0x23b   : > { %457 = vst [vmem:[%s268_s28] sm:$0xff] %v454_v58 }
 0x23c   : > { %902 = shalt.err (!%p899_p7)
}
 0x23d   : > { %s903_s12 = scalar_lea.hbm %s1206_s15, 128  ;;  %s907_s26 = scalar_lea.hbm %s1254_s5, 512 }
 0x23e   : > { %p904_p9 = scmp.ne.s32.totalorder %s1206_s15, %s903_s12  ;;  %p908_p0 = scmp.lt.u32.totalorder %s1206_s15, %s1254_s5 }
 0x23f   : > { %p909_p10 = scmp.lt.u32.totalorder %s907_s26, %s903_s12  ;;  %p911_p1 = scmp.lt.u32.totalorder %s903_s12, %s1206_s15 }
 0x240   : > { %p905_p12 = pnand %p904_p9, %p1112_p4 }
 0x241   : > { %p910_p11 = por %p909_p10, %p908_p0 }
 0x242   : > { %p906_p5 = pneg %p905_p12 }
 0x243   : > { %p912_p2 = por %p911_p1, %p910_p11 }
 0x245   : > { %p913_p6 = pnand %p912_p2, %p906_p5 }
 0x247   : > { %916 = shalt.err (!%p913_p6)
}
 0x248   : > { %741 = dma.vmem_to_hbm [thread:$0]  (%p1112_p4), %s1208_s7, 128, %s1206_s15, %s459_s16  }
 0x249 PF: > { %p763_p8 = scmp.ge.s32.totalorder %s959_s21, 2  ;;  %s484_s11 = sand.u32 1, %s947_s18  }
 0x24a   : > { %p1269_p13 = scmp.ne.s32.totalorder %s1259_s25, 0  ;;  %s485_s28 = scalar_lea.sflag [#allocation4], %s484_s11 }
 0x24c   : > { %p755_p3 = pnand %p763_p8, %p1269_p13 }
 0x24e   : > { %942 = dma.done.wait (!%p755_p3), %s485_s28, 128  }
 0x24f   : > { %944 = vsyncadd (!%p755_p3), %s485_s28, 4294967168  ;;  %p19_p7 = scmp.ge.s32.totalorder %s1102_s14, 6   ;;  %s1270_s18 = smov %s951_s19 }
 0x250   : > { %s1271_s19 = smov %s955_s20  ;;  %s1272_s20 = smov %s1118_s27 }
 0x251   : > { %s1273_s21 = smov %s1102_s14  ;;  %21 = sbr.rel (!%p19_p7) target bundleno = 6 (0x6), region = 93 }
 0x258   :  { %490 = vsyncpa [#allocation3], 1 }
 0x259   :  { %492 = vsyncpa [#allocation3 + $0x1], 1 }
 0x25a   :  { %493 = vsyncpa [#allocation6], 1 }
 0x25b   :  { %494 = vsyncpa [#allocation4], 1 }
 0x25c   :  { %496 = vsyncpa [#allocation4 + $0x1], 1 }

</bundles_post_ra>
